<compile_context>
chip_gen: v7x
topology: tpu7x:2x2x1
jax: 0.10.0
libtpu: 0.0.40
codegen_flags: <defaults>
</compile_context>

<pallas_src>
import jax
import jax.numpy as jnp
from jax.experimental import pallas as pl
from jax.experimental.pallas import tpu as pltpu


def _round_up(n, m):
    return ((n + m - 1) // m) * m


def mlp_kernel(xt_ref, w1_ref, b1_ref, w2_ref, b2_ref, w3_ref, b3_ref, o_ref):
    # Feature-major compute: xt is (in_dim, TB), batch on the lane axis.
    xt = xt_ref[...]

    # Layer 1: W1 @ x + b1, ReLU.  f32 accumulation; bias/ReLU stay f32
    # (v5e VPU has no bf16), only the next dot's operand is (optionally) bf16.
    h1 = jnp.dot(w1_ref[...], xt, preferred_element_type=jnp.float32)
    h1 = jnp.maximum(h1 + b1_ref[...], 0.0)                  # (hidden, TB) f32

    # Layer 2
    h2 = jnp.dot(w2_ref[...], h1.astype(w2_ref.dtype),
                 preferred_element_type=jnp.float32)
    h2 = jnp.maximum(h2 + b2_ref[...], 0.0)                  # (hidden, TB) f32

    # Layer 3 (no activation) -> lane-dense (out_dim, TB) store.
    y = jnp.dot(w3_ref[...], h2.astype(w3_ref.dtype),
                preferred_element_type=jnp.float32)
    o_ref[...] = (y + b3_ref[...]).astype(o_ref.dtype)


def mlp_forward(x, params, *, tb_max=512, use_bf16=False):
    """x: (B, input_dim) f32.  params: PyTorch-layout weights/biases.

    Returns (B, output_dim) f32, matching nn.Sequential(Linear, ReLU, Linear,
    ReLU, Linear).
    """
    w1, b1 = params["w1"], params["b1"]          # (H, I), (H, 1)
    w2, b2 = params["w2"], params["b2"]          # (H, H), (H, 1)
    w3, b3 = params["w3"], params["b3"]          # (O, H), (O, 1)

    B, in_dim = x.shape
    out_dim = w3.shape[0]

    # Batch tile: multiple of 128 lanes; pad B up to a whole number of tiles.
    tb_max = _round_up(tb_max, 128)
    tb = tb_max if B >= tb_max else _round_up(B, 128)
    b_pad = _round_up(B, tb)
    n_tiles = b_pad // tb

    # Present x feature-major: (in_dim, B_pad), batch on the lane axis.  The
    # wrapper-side pad/transpose is cheap layout plumbing (XLA).  Padded
    # columns are zero and simply discarded at the end.
    x_t = jnp.pad(x, ((0, b_pad - B), (0, 0))).T

    if use_bf16:
        # bf16 operands for v6e/v7x's bf16-native MXU; accumulation stays f32.
        x_t = x_t.astype(jnp.bfloat16)
        w1, w2, w3 = (w.astype(jnp.bfloat16) for w in (w1, w2, w3))

    resident = lambda a: pl.BlockSpec(a.shape, lambda i: (0, 0))

    y_t = pl.pallas_call(
        mlp_kernel,
        out_shape=jax.ShapeDtypeStruct((out_dim, b_pad), jnp.float32),
        grid=(n_tiles,),
        in_specs=[
            pl.BlockSpec((in_dim, tb), lambda i: (0, i)),   # x tile (pipelined)
            resident(w1), resident(b1),
            resident(w2), resident(b2),
            resident(w3), resident(b3),
        ],
        out_specs=pl.BlockSpec((out_dim, tb), lambda i: (0, i)),
        compiler_params=pltpu.CompilerParams(
            dimension_semantics=("parallel",)),             # v7x dual-TC
    )(x_t, w1, b1, w2, b2, w3, b3)

    return y_t[:, :B].T                                     # (B, out_dim)


def init_params(key, input_dim=20, hidden_dim=64, output_dim=1):
    """Deterministic init mimicking torch.nn.Linear (uniform +/- 1/sqrt(fan_in)).
    Weights kept in PyTorch layout (out_features, in_features); biases stored
    as column vectors (out_features, 1) for the feature-major kernel."""
    ks = jax.random.split(key, 6)

    def linear(kw, kb, fan_in, fan_out):
        bound = 1.0 / jnp.sqrt(fan_in)
        w = jax.random.uniform(kw, (fan_out, fan_in), jnp.float32, -bound, bound)
        b = jax.random.uniform(kb, (fan_out, 1), jnp.float32, -bound, bound)
        return w, b

    w1, b1 = linear(ks[0], ks[1], input_dim, hidden_dim)
    w2, b2 = linear(ks[2], ks[3], hidden_dim, hidden_dim)
    w3, b3 = linear(ks[4], ks[5], hidden_dim, output_dim)
    return {"w1": w1, "b1": b1, "w2": w2, "b2": b2, "w3": w3, "b3": b3}


def mlp_reference(x, params):
    """Pure-JAX reference (PyTorch semantics: x @ W.T + b)."""
    h = jnp.maximum(x @ params["w1"].T + params["b1"].T, 0.0)
    h = jnp.maximum(h @ params["w2"].T + params["b2"].T, 0.0)
    return h @ params["w3"].T + params["b3"].T


if __name__ == "__main__":
    key = jax.random.PRNGKey(0)
    k_x, k_x2, k_p = jax.random.split(key, 3)

    INPUT_DIM, HIDDEN_DIM, OUTPUT_DIM = 20, 64, 1
    params = init_params(k_p, INPUT_DIM, HIDDEN_DIM, OUTPUT_DIM)

    # 1) Small batch (single tile), f32: tight correctness check.
    x_small = jax.random.normal(k_x, (8, INPUT_DIM), jnp.float32)
    out = jax.block_until_ready(mlp_forward(x_small, params))
    ref = mlp_reference(x_small, params)
    assert out.shape == (8, OUTPUT_DIM), out.shape
    assert jnp.allclose(out, ref, atol=1e-4, rtol=1e-4), \
        f"max abs err {jnp.max(jnp.abs(out - ref))}"

    # 2) Non-multiple batch exercising the multi-tile grid path (3 grid steps
    #    with tb_max=128) plus batch padding.
    x_med = jax.random.normal(k_x2, (300, INPUT_DIM), jnp.float32)
    out2 = jax.block_until_ready(mlp_forward(x_med, params, tb_max=128))
    ref2 = mlp_reference(x_med, params)
    assert out2.shape == (300, OUTPUT_DIM), out2.shape
    assert jnp.allclose(out2, ref2, atol=1e-4, rtol=1e-4), \
        f"max abs err {jnp.max(jnp.abs(out2 - ref2))}"

    # 3) bf16 operands (v6e/v7x MXU-native), f32 accumulation: loose check.
    out3 = jax.block_until_ready(
        mlp_forward(x_med, params, tb_max=128, use_bf16=True))
    assert out3.shape == (300, OUTPUT_DIM), out3.shape
    assert jnp.max(jnp.abs(out3 - ref2)) < 1e-1, \
        f"bf16 max abs err {jnp.max(jnp.abs(out3 - ref2))}"

    print("KERNEL_OK")
</pallas_src>

<mosaic_0001>
module attributes {stable_mosaic.version = 11 : i64} {
  func.func @mlp_kernel(%arg0: i32, %arg1: memref<20x128xf32, #tpu.memory_space<vmem>>, %arg2: memref<64x20xf32, #tpu.memory_space<vmem>>, %arg3: memref<64x1xf32, #tpu.memory_space<vmem>>, %arg4: memref<64x64xf32, #tpu.memory_space<vmem>>, %arg5: memref<64x1xf32, #tpu.memory_space<vmem>>, %arg6: memref<1x64xf32, #tpu.memory_space<vmem>>, %arg7: memref<1x1xf32, #tpu.memory_space<vmem>>, %arg8: memref<1x128xf32, #tpu.memory_space<vmem>>) attributes {dimension_semantics = [#tpu.dimension_semantics<parallel>], iteration_bounds = array<i64: 1>, scalar_prefetch = 0 : i64, scratch_operands = 0 : i64, tpu.core_type = #tpu.core_type<tc>, window_params = [{transform_indices = @transform_0, window_bounds = array<i64: 20, 128>}, {pipeline_mode = #tpu.pipeline_mode<synchronous>, transform_indices = @transform_1, window_bounds = array<i64: 64, 20>}, {pipeline_mode = #tpu.pipeline_mode<synchronous>, transform_indices = @transform_2, window_bounds = array<i64: 64, 1>}, {pipeline_mode = #tpu.pipeline_mode<synchronous>, transform_indices = @transform_3, window_bounds = array<i64: 64, 64>}, {pipeline_mode = #tpu.pipeline_mode<synchronous>, transform_indices = @transform_4, window_bounds = array<i64: 64, 1>}, {pipeline_mode = #tpu.pipeline_mode<synchronous>, transform_indices = @transform_5, window_bounds = array<i64: 1, 64>}, {pipeline_mode = #tpu.pipeline_mode<synchronous>, transform_indices = @transform_6, window_bounds = array<i64: 1, 1>}, {transform_indices = @transform_7, window_bounds = array<i64: 1, 128>}]} {
    %c0 = arith.constant 0 : index
    %c0_0 = arith.constant 0 : index
    %0 = vector.load %arg1[%c0, %c0_0] : memref<20x128xf32, #tpu.memory_space<vmem>>, vector<20x128xf32>
    %c0_1 = arith.constant 0 : index
    %c0_2 = arith.constant 0 : index
    %1 = vector.load %arg2[%c0_1, %c0_2] : memref<64x20xf32, #tpu.memory_space<vmem>>, vector<64x20xf32>
    %cst = arith.constant dense<0.000000e+00> : vector<64x128xf32>
    %2 = tpu.matmul %1, %0, %cst {dimension_numbers = #tpu.dot_dimension_numbers<[1], [0], [0], [1], [0, 0, 1, 1], [], []>} : vector<64x20xf32>, vector<20x128xf32>, vector<64x128xf32> -> vector<64x128xf32>
    %c0_3 = arith.constant 0 : index
    %c0_4 = arith.constant 0 : index
    %3 = vector.load %arg3[%c0_3, %c0_4] : memref<64x1xf32, #tpu.memory_space<vmem>>, vector<64x1xf32>
    %4 = vector.broadcast %3 : vector<64x1xf32> to vector<64x128xf32>
    %5 = arith.addf %2, %4 : vector<64x128xf32>
    %cst_5 = arith.constant 0.000000e+00 : f32
    %6 = vector.broadcast %cst_5 : f32 to vector<64x128xf32>
    %7 = arith.maximumf %5, %6 : vector<64x128xf32>
    %c0_6 = arith.constant 0 : index
    %c0_7 = arith.constant 0 : index
    %8 = vector.load %arg4[%c0_6, %c0_7] : memref<64x64xf32, #tpu.memory_space<vmem>>, vector<64x64xf32>
    %cst_8 = arith.constant dense<0.000000e+00> : vector<64x128xf32>
    %9 = tpu.matmul %8, %7, %cst_8 {dimension_numbers = #tpu.dot_dimension_numbers<[1], [0], [0], [1], [0, 0, 1, 1], [], []>} : vector<64x64xf32>, vector<64x128xf32>, vector<64x128xf32> -> vector<64x128xf32>
    %c0_9 = arith.constant 0 : index
    %c0_10 = arith.constant 0 : index
    %10 = vector.load %arg5[%c0_9, %c0_10] : memref<64x1xf32, #tpu.memory_space<vmem>>, vector<64x1xf32>
    %11 = vector.broadcast %10 : vector<64x1xf32> to vector<64x128xf32>
    %12 = arith.addf %9, %11 : vector<64x128xf32>
    %cst_11 = arith.constant 0.000000e+00 : f32
    %13 = vector.broadcast %cst_11 : f32 to vector<64x128xf32>
    %14 = arith.maximumf %12, %13 : vector<64x128xf32>
    %c0_12 = arith.constant 0 : index
    %c0_13 = arith.constant 0 : index
    %15 = vector.load %arg6[%c0_12, %c0_13] : memref<1x64xf32, #tpu.memory_space<vmem>>, vector<1x64xf32>
    %cst_14 = arith.constant dense<0.000000e+00> : vector<1x128xf32>
    %16 = tpu.matmul %15, %14, %cst_14 {dimension_numbers = #tpu.dot_dimension_numbers<[1], [0], [0], [1], [0, 0, 1, 1], [], []>} : vector<1x64xf32>, vector<64x128xf32>, vector<1x128xf32> -> vector<1x128xf32>
    %c0_15 = arith.constant 0 : index
    %c0_16 = arith.constant 0 : index
    %17 = vector.load %arg7[%c0_15, %c0_16] : memref<1x1xf32, #tpu.memory_space<vmem>>, vector<1x1xf32>
    %18 = vector.broadcast %17 : vector<1x1xf32> to vector<1x128xf32>
    %19 = arith.addf %16, %18 : vector<1x128xf32>
    %c0_17 = arith.constant 0 : index
    %c0_18 = arith.constant 0 : index
    %20 = vector.load %arg8[%c0_17, %c0_18] : memref<1x128xf32, #tpu.memory_space<vmem>>, vector<1x128xf32>
    tpu.vector_store %arg8[%c0_17, %c0_18], %19 {strides = array<i32>} : memref<1x128xf32, #tpu.memory_space<vmem>>, vector<1x128xf32>,
    return
  }
  func.func @transform_0(%arg0: i32) -> (i32, i32) {
    %c0_i32 = arith.constant 0 : i32
    %c0_i32_0 = arith.constant 0 : i32
    return %c0_i32, %arg0 : i32, i32
  }
  func.func @transform_1(%arg0: i32) -> (i32, i32) {
    %c0_i32 = arith.constant 0 : i32
    %c0_i32_0 = arith.constant 0 : i32
    %c0_i32_1 = arith.constant 0 : i32
    return %c0_i32, %c0_i32_0 : i32, i32
  }
  func.func @transform_2(%arg0: i32) -> (i32, i32) {
    %c0_i32 = arith.constant 0 : i32
    %c0_i32_0 = arith.constant 0 : i32
    %c0_i32_1 = arith.constant 0 : i32
    return %c0_i32, %c0_i32_0 : i32, i32
  }
  func.func @transform_3(%arg0: i32) -> (i32, i32) {
    %c0_i32 = arith.constant 0 : i32
    %c0_i32_0 = arith.constant 0 : i32
    %c0_i32_1 = arith.constant 0 : i32
    return %c0_i32, %c0_i32_0 : i32, i32
  }
  func.func @transform_4(%arg0: i32) -> (i32, i32) {
    %c0_i32 = arith.constant 0 : i32
    %c0_i32_0 = arith.constant 0 : i32
    %c0_i32_1 = arith.constant 0 : i32
    return %c0_i32, %c0_i32_0 : i32, i32
  }
  func.func @transform_5(%arg0: i32) -> (i32, i32) {
    %c0_i32 = arith.constant 0 : i32
    %c0_i32_0 = arith.constant 0 : i32
    %c0_i32_1 = arith.constant 0 : i32
    return %c0_i32, %c0_i32_0 : i32, i32
  }
  func.func @transform_6(%arg0: i32) -> (i32, i32) {
    %c0_i32 = arith.constant 0 : i32
    %c0_i32_0 = arith.constant 0 : i32
    %c0_i32_1 = arith.constant 0 : i32
    return %c0_i32, %c0_i32_0 : i32, i32
  }
  func.func @transform_7(%arg0: i32) -> (i32, i32) {
    %c0_i32 = arith.constant 0 : i32
    %c0_i32_0 = arith.constant 0 : i32
    return %c0_i32, %arg0 : i32, i32
  }
}

</mosaic_0001>

<bundles_post_ra>
// kernel: tpu_custom_call.1
= control target key start
LH: loop header
LB: loop body
LE: loop exit
PB: predicated region body
PF: predicated region fallthrough
CT: control target
= control target key end

     0   :  { %s892_s0 = inlined_call_operand.vmem [shape: f32[20,128], index: 0, kind: input, shape index: {}]   ;;  %s893_s1 = inlined_call_operand.vmem [shape: f32[64,20], index: 1, kind: input, shape index: {}]   ;;  %s894_s2 = inlined_call_operand.vmem [shape: f32[64,1], index: 2, kind: input, shape index: {}]   ;;  %s895_s3 = inlined_call_operand.vmem [shape: f32[64,64], index: 3, kind: input, shape index: {}]   ;;  %s896_s4 = inlined_call_operand.vmem [shape: f32[64,1], index: 4, kind: input, shape index: {}]   ;;  %s897_s5 = inlined_call_operand.vmem [shape: f32[1,64], index: 5, kind: input, shape index: {}]   ;;  %s898_s6 = inlined_call_operand.<no memory space> [shape: f32[1,1], index: 6, kind: input, shape index: {}]   ;;  %s899_s7 = inlined_call_operand.hbm [shape: f32[1,128], index: 7, kind: output, shape index: {}]  }
   0x1   :  { %v12_v0 = vstv %s898_s6 }
   0x2   :  { %13 = vst [vmem:[#allocation2] sm:$0x1] %v12_v0 }
   0x3   :  { %v29_v1 = vld [vmem:[%s892_s0] sm:$0xff]  ;;  %v30_v2 = vld [vmem:[%s892_s0 + $0x8] sm:$0xff]  ;;  %vm88_vm0 = vcmask 162816   ;;  %v31_v5 = vld [vmem:[%s892_s0 + $0x10] sm:$0xf]  ;;  %vm113_vm1 = vcmask 1043456  }
   0x4   :  { %v642_v3 = vpack.c.bf16 %v30_v2, %v29_v1  ;;  %v32_v4 = vld [vmem:[%s893_s1] sm:$0xff]  ;;  %v705_v6 = vmov 0   ;;  %v42_v8 = vld [vmem:[%s894_s2 + $0x10] sm:$0xff]  ;;  %v41_v9 = vld [vmem:[%s894_s2 + $0x8] sm:$0xff] }
   0x5   :  { %583 = vmatprep.mubr.msk.f32.mxu0 %vm88_vm0, %v32_v4  ;;  %679 = vset.pattern.permute.xlu0 %v705_v6  ;;  %v40_v7 = vld [vmem:[%s894_s2] sm:$0xff]  ;;  %v33_v10 = vld [vmem:[%s893_s1 + $0x8] sm:$0xff]  ;;  %v43_v11 = vld [vmem:[%s894_s2 + $0x18] sm:$0xff] }
   0x6   :  { %643 = vmatprep.subr.bf16.mxu0 %v642_v3  ;;  %680 = vset.pattern.permute.xlu1 %v705_v6  ;;  %v34_v12 = vld [vmem:[%s893_s1 + $0x10] sm:$0xff]  ;;  %v44_v13 = vld [vmem:[%s894_s2 + $0x20] sm:$0xff] }
   0x7   :  { %645 = vmatpush3.bf16.msra.mxu0 %v642_v3  ;;  %50 = vperm.xlu0 %679, %v40_v7  }
   0x8   :  { %581 = vmatprep.subr.msk.mxu0 %vm113_vm1, %v31_v5  ;;  %60 = vperm.xlu1 %680, %v42_v8  }
   0xb   :  { %582 = vmatpush3.msk.msra.mxu0 %vm113_vm1, %v31_v5  ;;  %55 = vperm.xlu0 %679, %v41_v9  }
   0xc   :  { %584 = vmatmul.mubr.msk.f32.vlgmr.msra.gmra.mrb[0].mxu0 %vm88_vm0, %v33_v10  ;;  %65 = vperm.xlu1 %680, %v43_v11  }
   0xd   :  { %14 = vsyncpa [#allocation4], 0  ;;  %586 = vmatprep.mubr.msk.f32.mxu0 %vm88_vm0, %v34_v12  ;;  %v35_v14 = vld [vmem:[%s893_s1 + $0x18] sm:$0xff]  ;;  %v45_v15 = vld [vmem:[%s894_s2 + $0x28] sm:$0xff]  ;;  %vm286_vm2 = vcmask 523264   ;;  %v706_v11 = vmov 0.0|0.0  }
   0xe   :  { %v36_v16 = vld [vmem:[%s893_s1 + $0x20] sm:$0xff]  ;;  %v46_v17 = vld [vmem:[%s894_s2 + $0x30] sm:$0xff]  ;;  %v37_v18 = vld [vmem:[%s893_s1 + $0x28] sm:$0xff]  ;;  %662 = vmatprep.subr.bf16.mxu0 %v706_v11  ;;  %vm707_vm3 = vmmov 0   ;;  %v708_v12 = vmov 0.0   ;;  %s709_s18 = smov [#allocation3]  }
   0xf   :  { %70 = vperm.xlu0 %679, %v44_v13   ;;  %v47_v19 = vld [vmem:[%s894_s2 + $0x38] sm:$0xff]  ;;  %v38_v20 = vld [vmem:[%s893_s1 + $0x30] sm:$0xff]  ;;  %v238_v21 = vld [vmem:[%s896_s4] sm:$0xff]  ;;  %s515_s19 = sshll.u32 %s709_s18, 4  ;;  %s516_s19 = int_to_ptr.vmem [resolvable:$true] %s515_s19 }
  0x10   :  { %587 = vmatmul.mubr.msk.f32.gmra.mrb[2].mxu0 %vm88_vm0, %v35_v14  ;;  %75 = vperm.xlu1 %680, %v45_v15   ;;  %v39_v22 = vld [vmem:[%s893_s1 + $0x38] sm:$0xff]  ;;  %v239_v23 = vld [vmem:[%s896_s4 + $0x8] sm:$0xff]  ;;  %v240_v24 = vld [vmem:[%s896_s4 + $0x10] sm:$0xff]  ;;  %s681_s20 = scalar_lea.vmem %s516_s19, 16  ;;  %s685_s21 = scalar_lea.vmem %s516_s19, 32 }
  0x11   :  { %589 = vmatprep.mubr.msk.f32.mxu0 %vm88_vm0, %v36_v16  ;;  %v241_v25 = vld [vmem:[%s896_s4 + $0x18] sm:$0xff]  ;;  %v242_v26 = vld [vmem:[%s896_s4 + $0x20] sm:$0xff]  ;;  %v243_v27 = vld [vmem:[%s896_s4 + $0x28] sm:$0xff]  ;;  %p682_p0 = scmp.ne.s32.totalorder %s516_s19, %s681_s20  ;;  %p686_p1 = scmp.lt.s32.totalorder %s516_s19, %s516_s19 }
  0x12   :  { %v244_v28 = vld [vmem:[%s896_s4 + $0x30] sm:$0xff]  ;;  %v245_v29 = vld [vmem:[%s896_s4 + $0x38] sm:$0xff]  ;;  %v425_v30 = vld [vmem:[#allocation2] sm:$0x1]  ;;  %p687_p2 = scmp.lt.s32.totalorder %s685_s21, %s681_s20 }
  0x13   :  { %80 = vperm.xlu0 %679, %v46_v17   ;;  %v230_v31 = vld [vmem:[%s895_s3] sm:$0xff]  ;;  %v231_v4 = vld [vmem:[%s895_s3 + $0x8] sm:$0xff]  ;;  %v232_v5 = vld [vmem:[%s895_s3 + $0x10] sm:$0xff] }
  0x14   :  { %590 = vmatmul.mubr.msk.f32.gmra.mrb[4].mxu0 %vm88_vm0, %v37_v18  ;;  %85 = vperm.xlu1 %680, %v47_v19   ;;  %v233_v6 = vld [vmem:[%s895_s3 + $0x18] sm:$0xff]  ;;  %v234_v7 = vld [vmem:[%s895_s3 + $0x20] sm:$0xff]  ;;  %v235_v8 = vld [vmem:[%s895_s3 + $0x28] sm:$0xff]  ;;  %p688_p3 = por %p687_p2, %p686_p1 }
  0x15   :  { %592 = vmatprep.mubr.msk.f32.mxu0 %vm88_vm0, %v38_v20  ;;  %611 = vmatprep.mubr.msk.f32.mxu1 %vm286_vm2, %v230_v31  ;;  %v236_v9 = vld [vmem:[%s895_s3 + $0x30] sm:$0xff]  ;;  %v237_v10 = vld [vmem:[%s895_s3 + $0x38] sm:$0xff] }
  0x16   :  { %p689_p4 = pnand %p688_p3, %p682_p0 }
  0x17   :  { %248 = vperm.xlu0 %679, %v238_v21  }
  0x18   :  { %593 = vmatmul.mubr.msk.f32.gmra.mrb[6].mxu0 %vm88_vm0, %v39_v22  ;;  %253 = vperm.xlu1 %680, %v239_v23  }
  0x19   :  { %639 = vmatprep.mubr.msk.f32.mxu0 %vm707_vm3, %v708_v12 }
  0x1b   :  { %258 = vperm.xlu0 %679, %v240_v24  }
  0x1c   :  { %263 = vperm.xlu1 %680, %v241_v25  }
  0x1f   :  { %268 = vperm.xlu0 %679, %v242_v26  }
  0x20   :  { %273 = vperm.xlu1 %680, %v243_v27  }
  0x23   :  { %278 = vperm.xlu0 %679, %v244_v28  }
  0x24   :  { %283 = vperm.xlu1 %680, %v245_v29  }
  0x27   :  { %428 = vperm.xlu0 %679, %v425_v30  }
  0x86   :  { %v51_v32 = vpop.permute.xlu0 %50 }
  0x87   :  { %v61_v33 = vpop.permute.xlu1 %60 }
  0x8a   :  { %v56_v34 = vpop.permute.xlu0 %55 }
  0x8b   :  { %v66_v35 = vpop.permute.xlu1 %65 }
  0x8e   :  { %v71_v48 = vpop.permute.xlu0 %70 }
  0x8f   :  { %v76_v45 = vpop.permute.xlu1 %75 }
  0x92   :  { %v81_v60 = vpop.permute.xlu0 %80 }
  0x93   :  { %v86_v57 = vpop.permute.xlu1 %85 }
  0x96   :  { %v249_v14 = vpop.permute.xlu0 %248 }
  0x97   :  { %v254_v13 = vpop.permute.xlu1 %253 }
  0x9a   :  { %v259_v17 = vpop.permute.xlu0 %258 }
  0x9b   :  { %v264_v15 = vpop.permute.xlu1 %263 }
  0x9e   :  { %v269_v29 = vpop.permute.xlu0 %268 }
  0x9f   :  { %v274_v26 = vpop.permute.xlu1 %273 }
  0xdf   :  { %v585_v36 = vpop.f32.mrb[0].mxu0 }
  0xe0   :  { %v189_v37 = vadd.f32 %v585_v36, %v56_v34  ;;  %v183_v38 = vpop.f32.mrb[1].mxu0 }
  0xe1   :  { %v184_v39 = vadd.f32 %v183_v38, %v51_v32  ;;  %v284_v38 = vpop.permute.xlu1 %283 }
  0xe2   :  { %v223_v40 = vmax.f32 %v189_v37, 0.0 }
  0xe3   :  { %v222_v41 = vmax.f32 %v184_v39, 0.0  ;;  %v588_v42 = vpop.f32.mrb[2].mxu0 }
  0xe4   :  { %v199_v43 = vadd.f32 %v588_v42, %v66_v35  ;;  %v193_v44 = vpop.f32.mrb[3].mxu0 }
  0xe5   :  { %v194_v46 = vadd.f32 %v193_v44, %v61_v33  ;;  %v646_v47 = vpack.c.bf16 %v223_v40, %v222_v41  ;;  %v279_v41 = vpop.permute.xlu0 %278 }
  0xe6   :  { %v225_v49 = vmax.f32 %v199_v43, 0.0 }
  0xe7   :  { %v224_v50 = vmax.f32 %v194_v46, 0.0  ;;  %v591_v51 = vpop.f32.mrb[4].mxu0  ;;  %647 = vmatprep.subr.bf16.mxu1 %v646_v47 }
  0xe8   :  { %v209_v52 = vadd.f32 %v591_v51, %v76_v45  ;;  %v203_v53 = vpop.f32.mrb[5].mxu0  ;;  %649 = vmatpush3.bf16.msra.mxu1 %v646_v47 }
  0xe9   :  { %v650_v54 = vpack.c.bf16 %v225_v49, %v224_v50  ;;  %v204_v55 = vadd.f32 %v203_v53, %v71_v48  ;;  %v424_v49 = vld [vmem:[%s897_s5] sm:$0x1]  ;;  %v431_v50 = vlaneseq  ;;  %v429_v53 = vpop.permute.xlu0 %428 }
  0xea   :  { %v227_v56 = vmax.f32 %v209_v52, 0.0 }
  0xeb   :  { %v226_v58 = vmax.f32 %v204_v55, 0.0  ;;  %v594_v59 = vpop.f32.mrb[6].mxu0  ;;  %651 = vmatprep.subr.bf16.mxu1 %v650_v54  ;;  %v432_v51 = vshrl.u32 %v431_v50, 7 }
  0xec   :  { %v219_v61 = vadd.f32 %v594_v59, %v86_v57  ;;  %v213_v62 = vpop.f32.mrb[7].mxu0  ;;  %653 = vmatpush3.bf16.msra.mxu1 %v650_v54 }
  0xed   :  { %v654_v63 = vpack.c.bf16 %v227_v56, %v226_v58  ;;  %v214_v0 = vadd.f32 %v213_v62, %v81_v60  ;;  %v433_v52 = vsub.s32 0, %v432_v51 }
  0xee   :  { %v229_v1 = vmax.f32 %v219_v61, 0.0 }
  0xef   :  { %v228_v2 = vmax.f32 %v214_v0, 0.0  ;;  %655 = vmatprep.subr.bf16.mxu1 %v654_v63  ;;  %v434_v54 = vrot.slane %v429_v53, %v433_v52 }
  0xf0   :  { %657 = vmatpush3.bf16.msra.mxu1 %v654_v63 }
  0xf1   :  { %v658_v3 = vpack.c.bf16 %v229_v1, %v228_v2 }
  0xf3   :  { %659 = vmatprep.subr.bf16.mxu1 %v658_v3 }
  0xf4   :  { %661 = vmatpush3.bf16.msra.mxu1 %v658_v3 }
  0xf7   :  { %612 = vmatmul.mubr.msk.f32.vlgmr.msra.gmra.mrb[0].mxu1 %vm286_vm2, %v231_v4 }
  0xf8   :  { %614 = vmatprep.mubr.msk.f32.mxu1 %vm286_vm2, %v232_v5 }
  0xfb   :  { %615 = vmatmul.mubr.msk.f32.gmra.mrb[2].mxu1 %vm286_vm2, %v233_v6 }
  0xfc   :  { %617 = vmatprep.mubr.msk.f32.mxu1 %vm286_vm2, %v234_v7 }
  0xff   :  { %618 = vmatmul.mubr.msk.f32.gmra.mrb[4].mxu1 %vm286_vm2, %v235_v8 }
 0x100   :  { %620 = vmatprep.mubr.msk.f32.mxu1 %vm286_vm2, %v236_v9 }
 0x103   :  { %621 = vmatmul.mubr.msk.f32.gmra.mrb[6].mxu1 %vm286_vm2, %v237_v10 }
 0x1ca   :  { %v613_v16 = vpop.f32.mrb[0].mxu1 }
 0x1cb   :  { %v383_v18 = vadd.f32 %v613_v16, %v254_v13  ;;  %v377_v19 = vpop.f32.mrb[1].mxu1 }
 0x1cc   :  { %v378_v20 = vadd.f32 %v377_v19, %v249_v14 }
 0x1cd   :  { %v417_v21 = vmax.f32 %v383_v18, 0.0 }
 0x1ce   :  { %v416_v22 = vmax.f32 %v378_v20, 0.0  ;;  %v616_v23 = vpop.f32.mrb[2].mxu1 }
 0x1cf   :  { %v393_v24 = vadd.f32 %v616_v23, %v264_v15  ;;  %v387_v25 = vpop.f32.mrb[3].mxu1 }
 0x1d0   :  { %v663_v27 = vpack.c.bf16 %v417_v21, %v416_v22  ;;  %v388_v28 = vadd.f32 %v387_v25, %v259_v17 }
 0x1d1   :  { %v419_v30 = vmax.f32 %v393_v24, 0.0 }
 0x1d2   :  { %v418_v31 = vmax.f32 %v388_v28, 0.0  ;;  %v619_v32 = vpop.f32.mrb[4].mxu1  ;;  %664 = vmatpush3.bf16.msra.mxu0 %v663_v27 }
 0x1d3   :  { %v403_v33 = vadd.f32 %v619_v32, %v274_v26  ;;  %v397_v34 = vpop.f32.mrb[5].mxu1  ;;  %665 = vmatprep.subr.bf16.mxu0 %v706_v11 }
 0x1d4   :  { %v666_v35 = vpack.c.bf16 %v419_v30, %v418_v31  ;;  %v398_v36 = vadd.f32 %v397_v34, %v269_v29 }
 0x1d5   :  { %v421_v37 = vmax.f32 %v403_v33, 0.0 }
 0x1d6   :  { %v420_v39 = vmax.f32 %v398_v36, 0.0  ;;  %v622_v40 = vpop.f32.mrb[6].mxu1  ;;  %667 = vmatpush3.bf16.msra.mxu0 %v666_v35 }
 0x1d7   :  { %v413_v42 = vadd.f32 %v622_v40, %v284_v38  ;;  %v407_v43 = vpop.f32.mrb[7].mxu1  ;;  %668 = vmatprep.subr.bf16.mxu0 %v706_v11 }
 0x1d8   :  { %v669_v44 = vpack.c.bf16 %v421_v37, %v420_v39  ;;  %v408_v45 = vadd.f32 %v407_v43, %v279_v41 }
 0x1d9   :  { %v423_v46 = vmax.f32 %v413_v42, 0.0 }
 0x1da   :  { %v422_v47 = vmax.f32 %v408_v45, 0.0  ;;  %670 = vmatpush3.bf16.msra.mxu0 %v669_v44 }
 0x1db   :  { %671 = vmatprep.subr.bf16.mxu0 %v706_v11 }
 0x1dc   :  { %v672_v48 = vpack.c.bf16 %v423_v46, %v422_v47 }
 0x1de   :  { %673 = vmatpush3.bf16.msra.mxu0 %v672_v48 }
 0x1e1   :  { %640 = vmatmul.mubr.msk.f32.vlgmr.msra.gmra.mrb[8].mxu0 %vm286_vm2, %v424_v49 }
 0x2b4   :  { %v504_v55 = vpop.f32.mrb[8].mxu0 }
 0x2b5   :  { %v505_v56 = vadd.f32 %v504_v55, %v434_v54  ;;  %v641_v57 = vpop.f32.mrb[9].mxu0 }
 0x2b7   :  { %508 = vst [vmem:[#allocation3] sm:$0x1] %v505_v56 }
 0x2b8   :  { %692 = shalt.err (!%p689_p4)
}
 0x2b9   :  { %s693_s1 = scalar_lea.hbm %s899_s7, 16 }
 0x2ba   :  { %p694_p5 = scmp.ne.s32.totalorder %s899_s7, %s693_s1  ;;  %p697_p6 = scmp.lt.u32.totalorder %s693_s1, %s899_s7 }
 0x2bc   :  { %p699_p7 = pnand %p697_p6, %p694_p5 }
 0x2be   :  { %702 = shalt.err (!%p699_p7)
}
 0x2bf   :  { %518 = dma.vmem_to_hbm [thread:$0]  %s516_s19, 16, %s899_s7, [#allocation4]  }
 0x2c0   :  { %703 = dma.done.wait [#allocation4], 16  }
 0x2c1   :  { %704 = vsyncadd [#allocation4], 4294967280 }
 0x2c2   :  { %522 = vsyncpa [#allocation4], 1 }

</bundles_post_ra>
